<compile_context>
chip_gen: v7x
topology: tpu7x:2x2x1
jax: 0.10.0
libtpu: 0.0.40
codegen_flags: <defaults>
</compile_context>

<pallas_src>
import jax
import jax.numpy as jnp
from jax.experimental import pallas as pl
from jax.experimental.pallas import tpu as pltpu


# --------------------------------------------------------------------------
# Kernel bodies
# --------------------------------------------------------------------------

def _resident_gather_kernel(idx_ref, table_ref, out_ref):
    """Small-table path: whole (N, D) table is VMEM-resident.

    idx_ref  : SMEM (B_pad,) int32 scalar-prefetch indices.
    table_ref: VMEM (N, D)   full table (same block every step -> resident).
    out_ref  : VMEM (TB, D)  output block for grid step i.
    """
    i = pl.program_id(0)
    tb = out_ref.shape[0]
    for j in range(tb):                      # static unroll, TB small
        row = idx_ref[i * tb + j]            # scalar SMEM read
        # Dynamic first-axis index load from the resident table, static store.
        out_ref[j, :] = table_ref[row, :]


def _hbm_gather_kernel(idx_ref, table_hbm, out_ref, sem):
    """Large-table path: table stays in HBM, TB concurrent row DMAs per step.

    idx_ref  : SMEM (B_pad,) int32 scalar-prefetch indices.
    table_hbm: HBM  (N, D)   raw ref (memory_space=pl.ANY), no auto-DMA.
    out_ref  : VMEM (TB, D)  output block; rows are DMA'd straight into it.
    sem      : DMA semaphores, shape (TB,).
    """
    i = pl.program_id(0)
    tb = out_ref.shape[0]
    copies = []
    for j in range(tb):                      # issue all TB row DMAs first
        row = idx_ref[i * tb + j]
        cp = pltpu.make_async_copy(
            table_hbm.at[pl.ds(row, 1), :],  # (1, D) row in HBM
            out_ref.at[pl.ds(j, 1), :],      # (1, D) slot in the output block
            sem.at[j],
        )
        cp.start()
        copies.append(cp)
    for cp in copies:                        # then wait on all of them
        cp.wait()


# --------------------------------------------------------------------------
# Wrapper
# --------------------------------------------------------------------------

_RESIDENT_TABLE_BYTES = 16 << 20   # safe on v5e/v6e/v7x with explicit vmem limit


def _pick_tb(b, min_tb):
    """Largest TB in {64,32,16,8} (>= dtype minimum) that still gives >=2 grid
    steps (so v7x's two TensorCores can split the work)."""
    for tb in (64, 32, 16, 8):
        if tb >= min_tb and b >= 2 * tb:
            return tb
    return min_tb


def embedding_lookup(indices, table, *, mode="auto"):
    """indices: (B,) int -> out (B, D) with out[i] = table[indices[i]].

    Equivalent to nn.Embedding(indices) / jnp.take(table, indices, axis=0).
    mode: "auto" | "resident" | "hbm_gather" | "xla".
    """
    b = int(indices.shape[0])
    n, d = table.shape
    itemsize = jnp.dtype(table.dtype).itemsize
    table_bytes = n * d * itemsize

    # Clamp out-of-range ids so a bad index can never become an OOB DMA.
    idx = jnp.clip(indices.astype(jnp.int32), 0, n - 1)

    if mode == "auto":
        mode = "resident" if table_bytes <= _RESIDENT_TABLE_BYTES else "hbm_gather"

    if mode == "xla":
        return jnp.take(table, idx, axis=0)

    # Batch block size: sublane-full for the table dtype (8 for 32-bit,
    # 16 for 16-bit packing), padded batch so the grid divides evenly.
    min_tb = 8 if itemsize >= 4 else 16
    tb = _pick_tb(b, min_tb)
    b_pad = ((b + tb - 1) // tb) * tb
    if b_pad != b:
        idx = jnp.pad(idx, (0, b_pad - b))   # pad with (valid) row 0
    grid = (b_pad // tb,)

    out_spec = pl.BlockSpec((tb, d), lambda i, idx_ref: (i, 0))
    out_shape = jax.ShapeDtypeStruct((b_pad, d), table.dtype)
    cost = pl.CostEstimate(
        flops=0,
        transcendentals=0,
        bytes_accessed=2 * b_pad * d * itemsize + b_pad * 4,
    )

    if mode == "resident":
        grid_spec = pltpu.PrefetchScalarGridSpec(
            num_scalar_prefetch=1,
            grid=grid,
            in_specs=[
                # Full-table block; constant index_map keeps it VMEM-resident.
                pl.BlockSpec((n, d), lambda i, idx_ref: (0, 0)),
            ],
            out_specs=out_spec,
        )
        # Explicit VMEM budget: table + double-buffered (TB, D) outputs + slack.
        # Keeps the same cutoff valid on v5e (16 MiB scope), v6e, v7x (64 MiB).
        vmem_limit = int(min(table_bytes + 8 * tb * d * itemsize + (4 << 20),
                             48 << 20))
        out = pl.pallas_call(
            _resident_gather_kernel,
            out_shape=out_shape,
            grid_spec=grid_spec,
            compiler_params=pltpu.CompilerParams(
                dimension_semantics=("parallel",),
                vmem_limit_bytes=vmem_limit,
            ),
            cost_estimate=cost,
        )(idx, table)

    elif mode == "hbm_gather":
        grid_spec = pltpu.PrefetchScalarGridSpec(
            num_scalar_prefetch=1,
            grid=grid,
            in_specs=[
                # Table stays in HBM in its natural (N, D) layout.
                pl.BlockSpec(memory_space=pl.ANY),
            ],
            out_specs=out_spec,
            scratch_shapes=[pltpu.SemaphoreType.DMA((tb,))],
        )
        out = pl.pallas_call(
            _hbm_gather_kernel,
            out_shape=out_shape,
            grid_spec=grid_spec,
            compiler_params=pltpu.CompilerParams(
                dimension_semantics=("parallel",),
            ),
            cost_estimate=cost,
        )(idx, table)

    else:
        raise ValueError(f"unknown mode: {mode!r}")

    return out[:b] if b_pad != b else out


# --------------------------------------------------------------------------
# BaseModel analogue
# --------------------------------------------------------------------------

class BaseModelPallas:
    """JAX/Pallas analogue of BaseModel: holds an embedding table and exposes
    the embedding lookup as its compute path (forward itself is abstract)."""

    def __init__(self, n_time_series, embedding_dim, key):
        # Deterministic synthetic init (stands in for from_pretrained / load).
        self.embeddings = jax.random.normal(
            key, (n_time_series, embedding_dim), dtype=jnp.float32
        )

    def load_embeddings_from_numpy(self, embed_array):
        self.embeddings = jnp.asarray(embed_array, dtype=jnp.float32)

    def lookup(self, indices, mode="auto"):
        return embedding_lookup(indices, self.embeddings, mode=mode)

    def forward(self, *inputs):
        raise NotImplementedError("Forward method not implemented.")

    def calculate_loss(self, output, target):
        raise NotImplementedError("Loss calculation method not implemented.")


if __name__ == "__main__":
    key = jax.random.PRNGKey(0)
    k_tab, k_idx = jax.random.split(key)

    n_time_series = 16     # number of stock time series
    embedding_dim = 128    # embedding dimension (lane-aligned)
    batch = 16             # 2 grid steps at TB=8 -> megacore-splittable

    model = BaseModelPallas(n_time_series, embedding_dim, k_tab)
    indices = jax.random.randint(
        k_idx, (batch,), 0, n_time_series, dtype=jnp.int32
    )

    ref = jnp.take(model.embeddings, indices, axis=0)

    # Path 1: VMEM-resident table (auto-selected for small tables).
    out_res = jax.block_until_ready(model.lookup(indices))
    assert out_res.shape == (batch, embedding_dim)
    assert jnp.allclose(out_res, ref, atol=1e-6), "resident path mismatch"

    # Path 2: HBM manual-DMA batched gather (the large-table path).
    out_hbm = jax.block_until_ready(
        embedding_lookup(indices, model.embeddings, mode="hbm_gather")
    )
    assert out_hbm.shape == (batch, embedding_dim)
    assert jnp.allclose(out_hbm, ref, atol=1e-6), "hbm_gather path mismatch"

    print("KERNEL_OK")
</pallas_src>

<mosaic_0001>
module attributes {stable_mosaic.version = 11 : i64} {
  func.func @_resident_gather_kernel(%arg0: i32, %arg1: memref<16xi32, #tpu.memory_space<smem>>, %arg2: memref<16x128xf32, #tpu.memory_space<vmem>>, %arg3: memref<8x128xf32, #tpu.memory_space<vmem>>) attributes {dimension_semantics = [#tpu.dimension_semantics<parallel>], iteration_bounds = array<i64: 2>, scalar_prefetch = 1 : i64, scratch_operands = 0 : i64, tpu.core_type = #tpu.core_type<tc>, window_params = [{pipeline_mode = #tpu.pipeline_mode<synchronous>, transform_indices = @transform_0, window_bounds = array<i64: 16, 128>}, {transform_indices = @transform_1, window_bounds = array<i64: 8, 128>}]} {
    %c8_i32 = arith.constant 8 : i32
    %0 = arith.muli %arg0, %c8_i32 : i32
    %c0_i32 = arith.constant 0 : i32
    %1 = arith.addi %0, %c0_i32 : i32
    %2 = arith.index_cast %1 : i32 to index
    %3 = memref.load %arg1[%2] : memref<16xi32, #tpu.memory_space<smem>>
    %4 = arith.index_cast %3 : i32 to index
    %c0 = arith.constant 0 : index
    %5 = vector.load %arg2[%4, %c0] : memref<16x128xf32, #tpu.memory_space<vmem>>, vector<1x128xf32>
    %6 = vector.shape_cast %5 : vector<1x128xf32> to vector<128xf32>
    %c0_0 = arith.constant 0 : index
    %c0_1 = arith.constant 0 : index
    %7 = vector.load %arg3[%c0_0, %c0_1] : memref<8x128xf32, #tpu.memory_space<vmem>>, vector<1x128xf32>
    %8 = vector.shape_cast %7 : vector<1x128xf32> to vector<128xf32>
    %9 = vector.shape_cast %6 : vector<128xf32> to vector<1x128xf32>
    tpu.vector_store %arg3[%c0_0, %c0_1], %9 {strides = array<i32>} : memref<8x128xf32, #tpu.memory_space<vmem>>, vector<1x128xf32>,
    %c8_i32_2 = arith.constant 8 : i32
    %10 = arith.muli %arg0, %c8_i32_2 : i32
    %c1_i32 = arith.constant 1 : i32
    %11 = arith.addi %10, %c1_i32 : i32
    %12 = arith.index_cast %11 : i32 to index
    %13 = memref.load %arg1[%12] : memref<16xi32, #tpu.memory_space<smem>>
    %14 = arith.index_cast %13 : i32 to index
    %c0_3 = arith.constant 0 : index
    %15 = vector.load %arg2[%14, %c0_3] : memref<16x128xf32, #tpu.memory_space<vmem>>, vector<1x128xf32>
    %16 = vector.shape_cast %15 : vector<1x128xf32> to vector<128xf32>
    %c1 = arith.constant 1 : index
    %c0_4 = arith.constant 0 : index
    %17 = vector.load %arg3[%c1, %c0_4] : memref<8x128xf32, #tpu.memory_space<vmem>>, vector<1x128xf32>
    %18 = vector.shape_cast %17 : vector<1x128xf32> to vector<128xf32>
    %19 = vector.shape_cast %16 : vector<128xf32> to vector<1x128xf32>
    tpu.vector_store %arg3[%c1, %c0_4], %19 {strides = array<i32>} : memref<8x128xf32, #tpu.memory_space<vmem>>, vector<1x128xf32>,
    %c8_i32_5 = arith.constant 8 : i32
    %20 = arith.muli %arg0, %c8_i32_5 : i32
    %c2_i32 = arith.constant 2 : i32
    %21 = arith.addi %20, %c2_i32 : i32
    %22 = arith.index_cast %21 : i32 to index
    %23 = memref.load %arg1[%22] : memref<16xi32, #tpu.memory_space<smem>>
    %24 = arith.index_cast %23 : i32 to index
    %c0_6 = arith.constant 0 : index
    %25 = vector.load %arg2[%24, %c0_6] : memref<16x128xf32, #tpu.memory_space<vmem>>, vector<1x128xf32>
    %26 = vector.shape_cast %25 : vector<1x128xf32> to vector<128xf32>
    %c2 = arith.constant 2 : index
    %c0_7 = arith.constant 0 : index
    %27 = vector.load %arg3[%c2, %c0_7] : memref<8x128xf32, #tpu.memory_space<vmem>>, vector<1x128xf32>
    %28 = vector.shape_cast %27 : vector<1x128xf32> to vector<128xf32>
    %29 = vector.shape_cast %26 : vector<128xf32> to vector<1x128xf32>
    tpu.vector_store %arg3[%c2, %c0_7], %29 {strides = array<i32>} : memref<8x128xf32, #tpu.memory_space<vmem>>, vector<1x128xf32>,
    %c8_i32_8 = arith.constant 8 : i32
    %30 = arith.muli %arg0, %c8_i32_8 : i32
    %c3_i32 = arith.constant 3 : i32
    %31 = arith.addi %30, %c3_i32 : i32
    %32 = arith.index_cast %31 : i32 to index
    %33 = memref.load %arg1[%32] : memref<16xi32, #tpu.memory_space<smem>>
    %34 = arith.index_cast %33 : i32 to index
    %c0_9 = arith.constant 0 : index
    %35 = vector.load %arg2[%34, %c0_9] : memref<16x128xf32, #tpu.memory_space<vmem>>, vector<1x128xf32>
    %36 = vector.shape_cast %35 : vector<1x128xf32> to vector<128xf32>
    %c3 = arith.constant 3 : index
    %c0_10 = arith.constant 0 : index
    %37 = vector.load %arg3[%c3, %c0_10] : memref<8x128xf32, #tpu.memory_space<vmem>>, vector<1x128xf32>
    %38 = vector.shape_cast %37 : vector<1x128xf32> to vector<128xf32>
    %39 = vector.shape_cast %36 : vector<128xf32> to vector<1x128xf32>
    tpu.vector_store %arg3[%c3, %c0_10], %39 {strides = array<i32>} : memref<8x128xf32, #tpu.memory_space<vmem>>, vector<1x128xf32>,
    %c8_i32_11 = arith.constant 8 : i32
    %40 = arith.muli %arg0, %c8_i32_11 : i32
    %c4_i32 = arith.constant 4 : i32
    %41 = arith.addi %40, %c4_i32 : i32
    %42 = arith.index_cast %41 : i32 to index
    %43 = memref.load %arg1[%42] : memref<16xi32, #tpu.memory_space<smem>>
    %44 = arith.index_cast %43 : i32 to index
    %c0_12 = arith.constant 0 : index
    %45 = vector.load %arg2[%44, %c0_12] : memref<16x128xf32, #tpu.memory_space<vmem>>, vector<1x128xf32>
    %46 = vector.shape_cast %45 : vector<1x128xf32> to vector<128xf32>
    %c4 = arith.constant 4 : index
    %c0_13 = arith.constant 0 : index
    %47 = vector.load %arg3[%c4, %c0_13] : memref<8x128xf32, #tpu.memory_space<vmem>>, vector<1x128xf32>
    %48 = vector.shape_cast %47 : vector<1x128xf32> to vector<128xf32>
    %49 = vector.shape_cast %46 : vector<128xf32> to vector<1x128xf32>
    tpu.vector_store %arg3[%c4, %c0_13], %49 {strides = array<i32>} : memref<8x128xf32, #tpu.memory_space<vmem>>, vector<1x128xf32>,
    %c8_i32_14 = arith.constant 8 : i32
    %50 = arith.muli %arg0, %c8_i32_14 : i32
    %c5_i32 = arith.constant 5 : i32
    %51 = arith.addi %50, %c5_i32 : i32
    %52 = arith.index_cast %51 : i32 to index
    %53 = memref.load %arg1[%52] : memref<16xi32, #tpu.memory_space<smem>>
    %54 = arith.index_cast %53 : i32 to index
    %c0_15 = arith.constant 0 : index
    %55 = vector.load %arg2[%54, %c0_15] : memref<16x128xf32, #tpu.memory_space<vmem>>, vector<1x128xf32>
    %56 = vector.shape_cast %55 : vector<1x128xf32> to vector<128xf32>
    %c5 = arith.constant 5 : index
    %c0_16 = arith.constant 0 : index
    %57 = vector.load %arg3[%c5, %c0_16] : memref<8x128xf32, #tpu.memory_space<vmem>>, vector<1x128xf32>
    %58 = vector.shape_cast %57 : vector<1x128xf32> to vector<128xf32>
    %59 = vector.shape_cast %56 : vector<128xf32> to vector<1x128xf32>
    tpu.vector_store %arg3[%c5, %c0_16], %59 {strides = array<i32>} : memref<8x128xf32, #tpu.memory_space<vmem>>, vector<1x128xf32>,
    %c8_i32_17 = arith.constant 8 : i32
    %60 = arith.muli %arg0, %c8_i32_17 : i32
    %c6_i32 = arith.constant 6 : i32
    %61 = arith.addi %60, %c6_i32 : i32
    %62 = arith.index_cast %61 : i32 to index
    %63 = memref.load %arg1[%62] : memref<16xi32, #tpu.memory_space<smem>>
    %64 = arith.index_cast %63 : i32 to index
    %c0_18 = arith.constant 0 : index
    %65 = vector.load %arg2[%64, %c0_18] : memref<16x128xf32, #tpu.memory_space<vmem>>, vector<1x128xf32>
    %66 = vector.shape_cast %65 : vector<1x128xf32> to vector<128xf32>
    %c6 = arith.constant 6 : index
    %c0_19 = arith.constant 0 : index
    %67 = vector.load %arg3[%c6, %c0_19] : memref<8x128xf32, #tpu.memory_space<vmem>>, vector<1x128xf32>
    %68 = vector.shape_cast %67 : vector<1x128xf32> to vector<128xf32>
    %69 = vector.shape_cast %66 : vector<128xf32> to vector<1x128xf32>
    tpu.vector_store %arg3[%c6, %c0_19], %69 {strides = array<i32>} : memref<8x128xf32, #tpu.memory_space<vmem>>, vector<1x128xf32>,
    %c8_i32_20 = arith.constant 8 : i32
    %70 = arith.muli %arg0, %c8_i32_20 : i32
    %c7_i32 = arith.constant 7 : i32
    %71 = arith.addi %70, %c7_i32 : i32
    %72 = arith.index_cast %71 : i32 to index
    %73 = memref.load %arg1[%72] : memref<16xi32, #tpu.memory_space<smem>>
    %74 = arith.index_cast %73 : i32 to index
    %c0_21 = arith.constant 0 : index
    %75 = vector.load %arg2[%74, %c0_21] : memref<16x128xf32, #tpu.memory_space<vmem>>, vector<1x128xf32>
    %76 = vector.shape_cast %75 : vector<1x128xf32> to vector<128xf32>
    %c7 = arith.constant 7 : index
    %c0_22 = arith.constant 0 : index
    %77 = vector.load %arg3[%c7, %c0_22] : memref<8x128xf32, #tpu.memory_space<vmem>>, vector<1x128xf32>
    %78 = vector.shape_cast %77 : vector<1x128xf32> to vector<128xf32>
    %79 = vector.shape_cast %76 : vector<128xf32> to vector<1x128xf32>
    tpu.vector_store %arg3[%c7, %c0_22], %79 {strides = array<i32>} : memref<8x128xf32, #tpu.memory_space<vmem>>, vector<1x128xf32>,
    return
  }
  func.func @transform_0(%arg0: i32, %arg1: memref<16xi32, #tpu.memory_space<smem>>) -> (i32, i32) {
    %c0_i32 = arith.constant 0 : i32
    %c0_i32_0 = arith.constant 0 : i32
    %c0_i32_1 = arith.constant 0 : i32
    return %c0_i32, %c0_i32_0 : i32, i32
  }
  func.func @transform_1(%arg0: i32, %arg1: memref<16xi32, #tpu.memory_space<smem>>) -> (i32, i32) {
    %c0_i32 = arith.constant 0 : i32
    %c0_i32_0 = arith.constant 0 : i32
    return %arg0, %c0_i32 : i32, i32
  }
}

</mosaic_0001>

<bundles_post_ra>
// kernel: tpu_custom_call.1
= control target key start
LH: loop header
LB: loop body
LE: loop exit
PB: predicated region body
PF: predicated region fallthrough
CT: control target
= control target key end

     0   :  { %s575_s0 = inlined_call_operand.hbm [shape: s32[16], index: 0, kind: input, shape index: {}]   ;;  %s576_s1 = inlined_call_operand.hbm [shape: f32[16,128], index: 1, kind: input, shape index: {}]   ;;  %s577_s2 = inlined_call_operand.hbm [shape: f32[16,128], index: 2, kind: output, shape index: {}]  }
   0x1   :  { %s300_s11 = scalar_lea.hbm %s575_s0, 16 }
   0x2   :  { %p301_p0 = scmp.ne.s32.totalorder %s575_s0, %s300_s11  ;;  %p304_p1 = scmp.lt.u32.totalorder %s300_s11, %s575_s0 }
   0x4   :  { %p306_p2 = pnand %p304_p1, %p301_p0 }
   0x6   :  { %309 = shalt.err (!%p306_p2)  }
   0x7   :  { %s408_s16 = smov [#allocation3]  }
   0x8   :  { %8 = dma.hbm_to_smem %s575_s0, 16, %s408_s16, [#allocation2] }
   0x9   :  { %382 = dma.done.wait [#allocation2], 16 }
   0xa   :  { %383 = vsyncadd [#allocation2], 4294967280 }
   0xb   :  { %10 = sfence }
   0xc   :  { %11 = vsyncpa [#allocation5], 0 }
   0xd   :  { %12 = vsyncpa [#allocation6], 0 }
   0xe   :  { %14 = vsyncpa [#allocation6 + $0x1], 0  ;;  %s440_s19 = smov 0   ;;  %s442_s20 = smov 0  }
   0xf   :  { %s444_s21 = smov 0   ;;  %s446_s22 = smov 0  }
  0x10 LB: > { %s461_s0 = sadd.s32 4294967295, %s406_s22   ;;  %s236_s23 = sadd.s32 4294967294, %s406_s22   ;;  %s406_s22 = sphi %s446_s22, %s595_s22   ;;  %s402_s21 = sphi %s444_s21, %s594_s21   ;;  %s398_s20 = sphi %s442_s20, %s593_s20   ;;  %s394_s19 = sphi %s440_s19, %s592_s19  }
  0x11   : > { %s465_s24 = sadd.s32 1, %s406_s22   ;;  %s48_s25 = sadd.s32 1, %s402_s21 }
  0x12   : > { %s45_s26 = ssub.s32 %s406_s22, %s465_s24  ;;  %p58_p3 = scmp.ne.s32.totalorder %s402_s21, %s398_s20 }
  0x13   : > { %p46_p4 = scmp.eq.s32.totalorder %s45_s26, 0  ;;  %p59_p5 = scmp.eq.s32.totalorder %s461_s0, 1 }
  0x14   : > { %p64_p6 = scmp.ne.s32.totalorder %s398_s20, %s394_s19  ;;  %p65_p7 = scmp.eq.s32.totalorder %s236_s23, 1 }
  0x15   : > { %s476_s27 = scalar_select %p46_p4, %s402_s21, %s48_s25  }
  0x16   : > { %p478_p8 = por %p59_p5, %p58_p3  ;;  %p482_p9 = por %p65_p7, %p64_p6 }
  0x17   : > { %p237_p10 = scmp.ge.s32.totalorder %s406_s22, 1  ;;  %p72_p11 = scmp.lt.s32.totalorder %s406_s22, 3 }
  0x18   : > { %s582_s28 = scalar_select %p478_p8, 1, 0 }
  0x19   : > { %s583_s29 = scalar_select %p482_p9, 1, 0 }
  0x1a   : > { %p578_p12 = scmp.eq.s32.totalorder %s461_s0, 0  ;;  %p489_p13 = pnand %p237_p10, %p72_p11 }
  0x1b   : > { %s409_s3 = smov [#allocation4]   ;;  %s310_s8 = scalar_lea.hbm %s576_s1, 256 }
  0x1c   : > { %s584_s30 = scalar_select %p489_p13, 1, 0 }
  0x1d   : > { %s84_s4 = sshll.u32 %s409_s3, 4  ;;  %p253_p0 = pneg %p489_p13  ;;  %s85_s4 = int_to_ptr.vmem [resolvable:$true] %s84_s4 }
  0x1e   : > { %p311_p2 = scmp.ne.s32.totalorder %s576_s1, %s310_s8  ;;  %p317_p6 = scmp.lt.u32.totalorder %s310_s8, %s576_s1 }
  0x1f   : > { %p497_p1 = pnand %p578_p12, %p253_p0 }
  0x21   : > { %p312_p3 = pneg %p497_p1 }
  0x23   : > { %p313_p4 = pnand %p312_p3, %p311_p2 }
  0x25   : > { %p314_p5 = pneg %p313_p4 }
  0x27   : > { %p319_p7 = pnand %p317_p6, %p314_p5 }
  0x29   : > { %322 = shalt.err (!%p319_p7)
}
  0x2a   : > { %s323_s13 = scalar_lea.vmem %s85_s4, 256  ;;  %p331_p12 = scmp.lt.s32.totalorder %s85_s4, %s85_s4 }
  0x2b   : > { %p324_p10 = scmp.ne.s32.totalorder %s85_s4, %s323_s13  ;;  %p332_p9 = scmp.lt.s32.totalorder %s323_s13, %s323_s13 }
  0x2d   : > { %p326_p11 = pnand %p324_p10, %p312_p3  ;;  %p333_p8 = por %p332_p9, %p331_p12 }
  0x2f   : > { %p327_p0 = pneg %p326_p11 }
  0x31   : > { %p334_p13 = pnand %p333_p8, %p327_p0 }
  0x33   : > { %337 = shalt.err (!%p334_p13)
}
  0x34   : > { %s410_s14 = smov 128   ;;  %s411_s15 = smov 8  }
  0x35   : > { %256 = dma.hbm_to_vmem [thread:$0]  (!%p497_p1), %s576_s1, 256, %s85_s4, [#allocation5], %s410_s14, %s410_s14, %s411_s15  }
  0x36   : > { %p586_p2 = scmp.ne.s32.totalorder %s584_s30, 0 }
  0x37   : > { %p587_p4 = scmp.eq.s32.totalorder (!%p586_p2), %s461_s0, 0 }
  0x38   : > { %100 = sbr.rel (%p586_p2) target bundleno = 103 (0x67), region = 24 }
  0x3f   : > { %385 = dma.done.wait (%p587_p4), [#allocation5], 256   ;;  %p588_p3 = pmov %p587_p4 }
  0x40   : > { %s581_s18 = sand.u32 1, %s398_s20   ;;  %s242_s23 = sshll.u32 %s461_s0, 3 }
  0x41   : > { %387 = vsyncadd (%p588_p3), [#allocation5], 4294967040  ;;  %s241_s25 = sshll.u32 %s581_s18, 3  ;;  %s116_s26 = sld [smem:[#allocation3 + %s242_s23]] }
  0x42   : > { %s120_s3 = sadd.s32 1, %s242_s23  ;;  %s125_s5 = sadd.s32 2, %s242_s23 }
  0x43   : > { %s121_s4 = sld [smem:[#allocation3 + %s120_s3]]  ;;  %s130_s30 = sadd.s32 3, %s242_s23 }
  0x44   : > { %s126_s6 = sld [smem:[#allocation3 + %s125_s5]]  ;;  %s135_s7 = sadd.s32 4, %s242_s23 }
  0x45   : > { %s131_s8 = sld [smem:[#allocation3 + %s130_s30]]  ;;  %s140_s10 = sadd.s32 5, %s242_s23 }
  0x46   : > { %s136_s9 = sld [smem:[#allocation3 + %s135_s7]]  ;;  %s145_s13 = sadd.s32 6, %s242_s23 }
  0x47   : > { %s117_s11 = scalar_lea.vmem [#allocation4], %s116_s26  ;;  %s141_s12 = sld [smem:[#allocation3 + %s140_s10]] }
  0x48   : > { %v118_v0 = vld [vmem:[%s117_s11] sm:$0x1]  ;;  %s114_s14 = scalar_lea.vmem [#allocation7], %s241_s25  ;;  %s146_s15 = sld [smem:[#allocation3 + %s145_s13]] }
  0x49   : > { %119 = vst [vmem:[%s114_s14] sm:$0x1] %v118_v0  ;;  %s150_s16 = sadd.s32 7, %s242_s23  ;;  %s122_s17 = scalar_lea.vmem [#allocation4], %s121_s4 }
  0x4a   : > { %v123_v1 = vld [vmem:[%s122_s17] sm:$0x1]  ;;  %s127_s18 = scalar_lea.vmem [#allocation4], %s126_s6  ;;  %s151_s3 = sld [smem:[#allocation3 + %s150_s16]] }
  0x4b   : > { %v128_v2 = vld [vmem:[%s127_s18] sm:$0x1]  ;;  %124 = vst [vmem:[%s114_s14 + $0x1] sm:$0x1] %v123_v1  ;;  %s132_s5 = scalar_lea.vmem [#allocation4], %s131_s8  ;;  %s244_s26 = sshll.u32 %s461_s0, 7 }
  0x4c   : > { %129 = vst [vmem:[%s114_s14 + $0x2] sm:$0x1] %v128_v2  ;;  %v133_v3 = vld [vmem:[%s132_s5] sm:$0x1]  ;;  %s137_s30 = scalar_lea.vmem [#allocation4], %s136_s9  ;;  %s169_s25 = sshll.u32 %s114_s14, 4  ;;  %s533_s25 = int_to_ptr.vmem [resolvable:$true] %s169_s25 }
  0x4d   : > { %v138_v4 = vld [vmem:[%s137_s30] sm:$0x1]  ;;  %134 = vst [vmem:[%s114_s14 + $0x3] sm:$0x1] %v133_v3  ;;  %s142_s7 = scalar_lea.vmem [#allocation4], %s141_s12  ;;  %s531_s6 = scalar_lea.hbm %s577_s2, %s244_s26 }
  0x4e   : > { %139 = vst [vmem:[%s114_s14 + $0x4] sm:$0x1] %v138_v4  ;;  %v143_v5 = vld [vmem:[%s142_s7] sm:$0x1]  ;;  %s147_s23 = scalar_lea.vmem [#allocation4], %s146_s15  ;;  %s589_s8 = sand.u32 1, %s398_s20  }
  0x4f   : > { %144 = vst [vmem:[%s114_s14 + $0x5] sm:$0x1] %v143_v5  ;;  %v148_v6 = vld [vmem:[%s147_s23] sm:$0x1]  ;;  %s156_s9 = scalar_lea.sflag [#allocation6], %s589_s8  ;;  %s338_s10 = scalar_lea.vmem %s533_s25, 128 }
  0x50   : > { %149 = vst [vmem:[%s114_s14 + $0x6] sm:$0x1] %v148_v6  ;;  %s152_s0 = scalar_lea.vmem [#allocation4], %s151_s3  ;;  %p339_p8 = scmp.ne.s32.totalorder %s533_s25, %s338_s10 }
  0x51   : > { %v153_v7 = vld [vmem:[%s152_s0] sm:$0x1]  ;;  %p590_p9 = scmp.ne.s32.totalorder %s582_s28, 0  ;;  %s412_s11 = smov [#allocation7]  }
  0x52   : > { %154 = vst [vmem:[%s114_s14 + $0x7] sm:$0x1] %v153_v7  ;;  %s342_s12 = sshll.u32 %s412_s11, 4  ;;  %s343_s12 = int_to_ptr.vmem [resolvable:$false] %s342_s12 }
  0x53   : > { %p340_p12 = pnand %p339_p8, %p590_p9  ;;  %s344_s13 = scalar_lea.vmem %s343_s12, 256 }
  0x54   : > { %p345_p1 = scmp.lt.s32.totalorder %s533_s25, %s343_s12  ;;  %p346_p5 = scmp.lt.s32.totalorder %s344_s13, %s338_s10 }
  0x55   : > { %p341_p13 = pneg %p340_p12 }
  0x56   : > { %p347_p6 = por %p346_p5, %p345_p1 }
  0x58   : > { %p348_p7 = pnand %p347_p6, %p341_p13 }
  0x5a   : > { %351 = shalt.err (!%p348_p7)
}
  0x5b   : > { %s352_s14 = scalar_lea.hbm %s531_s6, 128  ;;  %s356_s17 = scalar_lea.hbm %s577_s2, 256 }
  0x5c   : > { %p353_p10 = scmp.ne.s32.totalorder %s531_s6, %s352_s14  ;;  %p357_p2 = scmp.lt.u32.totalorder %s531_s6, %s577_s2 }
  0x5d   : > { %p358_p4 = scmp.lt.u32.totalorder %s356_s17, %s352_s14  ;;  %p360_p8 = scmp.lt.u32.totalorder %s352_s14, %s531_s6 }
  0x5e   : > { %p354_p11 = pnand %p353_p10, %p590_p9 }
  0x5f   : > { %p359_p3 = por %p358_p4, %p357_p2 }
  0x60   : > { %p355_p0 = pneg %p354_p11 }
  0x61   : > { %p361_p12 = por %p360_p8, %p359_p3 }
  0x63   : > { %p362_p13 = pnand %p361_p12, %p355_p0 }
  0x65   : > { %365 = shalt.err (!%p362_p13)
}
  0x66   : > { %251 = dma.vmem_to_hbm [thread:$0]  (%p590_p9), %s533_s25, 128, %s531_s6, %s156_s9  }
  0x67 PF: > { %p263_p1 = scmp.ge.s32.totalorder %s406_s22, 2  ;;  %s181_s30 = sand.u32 1, %s394_s19  }
  0x68   : > { %p591_p5 = scmp.ne.s32.totalorder %s583_s29, 0  ;;  %s182_s26 = scalar_lea.sflag [#allocation6], %s181_s30 }
  0x6a   : > { %p258_p6 = pnand %p263_p1, %p591_p5 }
  0x6c   : > { %389 = dma.done.wait (!%p258_p6), %s182_s26, 128  }
  0x6d   : > { %391 = vsyncadd (!%p258_p6), %s182_s26, 4294967168  ;;  %p17_p7 = scmp.ge.s32.totalorder %s465_s24, 4   ;;  %s592_s19 = smov %s398_s20 }
  0x6e   : > { %s593_s20 = smov %s402_s21  ;;  %s594_s21 = smov %s476_s27 }
  0x6f   : > { %s595_s22 = smov %s465_s24  ;;  %19 = sbr.rel (!%p17_p7) target bundleno = 16 (0x10), region = 69 }
  0x76   :  { %187 = vsyncpa [#allocation5], 1 }
  0x77   :  { %189 = vsyncpa [#allocation5 + $0x1], 1 }
  0x78   :  { %190 = vsyncpa [#allocation6], 1 }
  0x79   :  { %192 = vsyncpa [#allocation6 + $0x1], 1 }

</bundles_post_ra>
